<compile_context>
chip_gen: v7x
topology: tpu7x:2x2x1
jax: 0.10.0
libtpu: 0.0.40
codegen_flags: <defaults>
</compile_context>

<pallas_src>
import jax
import jax.numpy as jnp
from jax.experimental import pallas as pl
from jax.experimental.pallas import tpu as pltpu

# Module hyper-parameters (from the PyTorch source; n_class chosen since it is
# external to the snippet).
N_CLASS = 20
EMBEDDING = 3
HIDDEN = 3
SEQ_LEN = 100                       # 100 * embedding(3) == 300, matching X.view(-1, 300)
IN_FEATURES = SEQ_LEN * EMBEDDING   # 300
FUSED_OUT = HIDDEN + 1              # [H | W] fused weight width = 4
CONST_W = 2 * HIDDEN + 2            # [d | U | b | pad] = 8 (lane-friendly width)


def nnlm_kernel(x_ref, hw_ref, const_ref, o_ref):
    """Fused NNLM forward for one batch tile.

    x_ref    : [TB, 300] bf16  embedded + flattened input tile (streamed)
    hw_ref   : [300, 4]  bf16  concat([H^T, W^T], axis=1): one MXU pass, both paths
    const_ref: [1, 8]    f32   [d(3) | U(3) | b(1) | 0]  (resident)
    o_ref    : [TB, 1]   f32   output tile
    """
    x = x_ref[...]
    # Single MXU pass, f32 accumulation: cols 0:3 -> H projection, col 3 -> W projection.
    hw = jnp.dot(x, hw_ref[...], preferred_element_type=jnp.float32)     # [TB, 4] f32

    d = const_ref[:, 0:HIDDEN]                                           # [1, 3]
    u = const_ref[:, HIDDEN:2 * HIDDEN]                                  # [1, 3]
    b = const_ref[:, 2 * HIDDEN:2 * HIDDEN + 1]                          # [1, 1]

    t = jnp.tanh(d + hw[:, 0:HIDDEN])                                    # [TB, 3]
    # U projection (K=3, N=1) on the VPU/XLU instead of a wasted MXU push.
    u_path = jnp.sum(t * u, axis=-1, keepdims=True)                      # [TB, 1]
    o_ref[...] = b + hw[:, HIDDEN:HIDDEN + 1] + u_path


def simple_forward(token_ids, params, *, max_tb=4096):
    """token_ids: [B, SEQ_LEN] int32 in [0, N_CLASS). Returns [B, 1] f32."""
    B = token_ids.shape[0]

    # Glue: embedding lookup + flatten (== self.C(X).view(-1, 300)), in bf16 so the
    # gather writeback and the kernel's x-stream read are half-width.
    C_bf16 = params["C"].astype(jnp.bfloat16)
    x_flat = jnp.take(C_bf16, token_ids, axis=0).reshape(B, IN_FEATURES)  # [B, 300] bf16

    # Fuse H and W weights into one [300, 4] bf16 matrix (single MXU pass).
    hw_cat = jnp.concatenate([params["Hw"], params["Ww"]],
                             axis=1).astype(jnp.bfloat16)                 # [300, 4] bf16

    # Fold d, U, b into one resident (1, 8) f32 constant.
    const = jnp.concatenate(
        [params["d"].reshape(1, HIDDEN),
         params["Uw"].reshape(1, HIDDEN),
         params["b"].reshape(1, 1),
         jnp.zeros((1, 1), jnp.float32)], axis=1)                         # [1, 8] f32

    # Step count first: >= 2 and even so both v7x TensorCores get work via the
    # "parallel" batch axis; then derive the tile from B (multiple of 16 for bf16
    # sublane packing) to bound zero-padding waste.
    n_steps = pl.cdiv(B, max_tb)
    n_steps = max(2, n_steps + (n_steps % 2))
    tb = 16 * pl.cdiv(pl.cdiv(B, n_steps), 16)
    bp = n_steps * tb
    if bp != B:
        x_flat = jnp.pad(x_flat, ((0, bp - B), (0, 0)))

    cost = pl.CostEstimate(
        flops=2 * bp * IN_FEATURES * FUSED_OUT + 12 * bp,
        transcendentals=bp * HIDDEN,
        bytes_accessed=(2 * bp * IN_FEATURES          # bf16 x stream
                        + 4 * bp                      # f32 output
                        + 2 * IN_FEATURES * FUSED_OUT # bf16 fused weight
                        + 4 * CONST_W),               # f32 constants
    )

    out = pl.pallas_call(
        nnlm_kernel,
        out_shape=jax.ShapeDtypeStruct((bp, 1), jnp.float32),
        grid=(n_steps,),
        in_specs=[
            pl.BlockSpec((tb, IN_FEATURES), lambda i: (i, 0)),           # x tile, pipelined
            pl.BlockSpec((IN_FEATURES, FUSED_OUT), lambda i: (0, 0)),    # resident weights
            pl.BlockSpec((1, CONST_W), lambda i: (0, 0)),                # resident d|U|b
        ],
        out_specs=pl.BlockSpec((tb, 1), lambda i: (i, 0)),
        compiler_params=pltpu.CompilerParams(
            dimension_semantics=("parallel",),
            vmem_limit_bytes=32 * 1024 * 1024,
        ),
        cost_estimate=cost,
    )(x_flat, hw_cat, const)
    return out[:B]


def init_params(key):
    kC, kH, kW, kU = jax.random.split(key, 4)
    params = {
        # nn.Embedding(n_class, embedding_size)
        "C": jax.random.normal(kC, (N_CLASS, EMBEDDING), jnp.float32),
        # nn.Linear(300, hidden, bias=False) weight is [hidden, 300]; store transposed.
        "Hw": jax.random.normal(kH, (IN_FEATURES, HIDDEN), jnp.float32) * 0.05,
        # nn.Parameter(torch.ones(n_hidden))
        "d": jnp.ones((1, HIDDEN), jnp.float32),
        # nn.Linear(300, 1, bias=False) -> transposed [300, 1]
        "Ww": jax.random.normal(kW, (IN_FEATURES, 1), jnp.float32) * 0.05,
        # nn.Linear(hidden, 1, bias=False) -> transposed [3, 1]
        "Uw": jax.random.normal(kU, (HIDDEN, 1), jnp.float32) * 0.3,
        # nn.Parameter(torch.ones(1))
        "b": jnp.ones((1, 1), jnp.float32),
    }
    return params


def reference_forward(token_ids, params):
    """Pure-JAX f32 reference mirroring the PyTorch forward exactly."""
    x = jnp.take(params["C"], token_ids, axis=0).reshape(token_ids.shape[0], IN_FEATURES)
    tanh = jnp.tanh(params["d"] + x @ params["Hw"])
    return params["b"] + x @ params["Ww"] + tanh @ params["Uw"]


if __name__ == "__main__":
    key = jax.random.PRNGKey(0)
    k_param, k_data = jax.random.split(key)

    params = init_params(k_param)

    B = 4
    token_ids = jax.random.randint(k_data, (B, SEQ_LEN), 0, N_CLASS, dtype=jnp.int32)

    out = simple_forward(token_ids, params)
    out = jax.block_until_ready(out)

    ref = reference_forward(token_ids, params)
    assert out.shape == (B, 1), out.shape
    # bf16 x-stream inputs, f32 accumulation -> loosened tolerance.
    assert jnp.allclose(out, ref, atol=2e-2, rtol=2e-2), (out, ref)

    print("KERNEL_OK")
</pallas_src>

<mosaic_0001>
module attributes {stable_mosaic.version = 11 : i64} {
  func.func @nnlm_kernel(%arg0: i32, %arg1: memref<16x300xbf16, #tpu.memory_space<vmem>>, %arg2: memref<300x4xbf16, #tpu.memory_space<vmem>>, %arg3: memref<1x8xf32, #tpu.memory_space<vmem>>, %arg4: memref<16x1xf32, #tpu.memory_space<vmem>>) attributes {dimension_semantics = [#tpu.dimension_semantics<parallel>], iteration_bounds = array<i64: 2>, scalar_prefetch = 0 : i64, scratch_operands = 0 : i64, tpu.core_type = #tpu.core_type<tc>, window_params = [{transform_indices = @transform_0, window_bounds = array<i64: 16, 300>}, {pipeline_mode = #tpu.pipeline_mode<synchronous>, transform_indices = @transform_1, window_bounds = array<i64: 300, 4>}, {pipeline_mode = #tpu.pipeline_mode<synchronous>, transform_indices = @transform_2, window_bounds = array<i64: 1, 8>}, {transform_indices = @transform_3, window_bounds = array<i64: 16, 1>}]} {
    %c0 = arith.constant 0 : index
    %c0_0 = arith.constant 0 : index
    %0 = vector.load %arg1[%c0, %c0_0] : memref<16x300xbf16, #tpu.memory_space<vmem>>, vector<16x300xbf16>
    %c0_1 = arith.constant 0 : index
    %c0_2 = arith.constant 0 : index
    %1 = vector.load %arg2[%c0_1, %c0_2] : memref<300x4xbf16, #tpu.memory_space<vmem>>, vector<300x4xbf16>
    %cst = arith.constant dense<0.000000e+00> : vector<16x4xf32>
    %2 = tpu.matmul %0, %1, %cst {dimension_numbers = #tpu.dot_dimension_numbers<[1], [0], [0], [1], [0, 0, 1, 1], [], []>} : vector<16x300xbf16>, vector<300x4xbf16>, vector<16x4xf32> -> vector<16x4xf32>
    %c0_3 = arith.constant 0 : index
    %c0_4 = arith.constant 0 : index
    %3 = vector.load %arg3[%c0_3, %c0_4] : memref<1x8xf32, #tpu.memory_space<vmem>>, vector<1x3xf32>
    %c0_5 = arith.constant 0 : index
    %c3 = arith.constant 3 : index
    %4 = vector.load %arg3[%c0_5, %c3] : memref<1x8xf32, #tpu.memory_space<vmem>>, vector<1x3xf32>
    %c0_6 = arith.constant 0 : index
    %c6 = arith.constant 6 : index
    %5 = vector.load %arg3[%c0_6, %c6] : memref<1x8xf32, #tpu.memory_space<vmem>>, vector<1x1xf32>
    %6 = vector.extract_strided_slice %2 {offsets = [0, 0], sizes = [16, 3], strides = [1, 1]} : vector<16x4xf32> to vector<16x3xf32>
    %7 = vector.broadcast %3 : vector<1x3xf32> to vector<16x3xf32>
    %8 = arith.addf %7, %6 : vector<16x3xf32>
    %9 = math.tanh %8 : vector<16x3xf32>
    %10 = vector.broadcast %4 : vector<1x3xf32> to vector<16x3xf32>
    %11 = arith.mulf %9, %10 : vector<16x3xf32>
    %cst_7 = arith.constant dense<0.000000e+00> : vector<16xf32>
    %12 = vector.multi_reduction <add>, %11, %cst_7 [1] : vector<16x3xf32> to vector<16xf32>
    %13 = vector.shape_cast %12 : vector<16xf32> to vector<16x1xf32>
    %14 = vector.extract_strided_slice %2 {offsets = [0, 3], sizes = [16, 1], strides = [1, 1]} : vector<16x4xf32> to vector<16x1xf32>
    %15 = vector.broadcast %5 : vector<1x1xf32> to vector<16x1xf32>
    %16 = arith.addf %15, %14 : vector<16x1xf32>
    %17 = arith.addf %16, %13 : vector<16x1xf32>
    %c0_8 = arith.constant 0 : index
    %c0_9 = arith.constant 0 : index
    %18 = vector.load %arg4[%c0_8, %c0_9] : memref<16x1xf32, #tpu.memory_space<vmem>>, vector<16x1xf32>
    tpu.vector_store %arg4[%c0_8, %c0_9], %17 {strides = array<i32>} : memref<16x1xf32, #tpu.memory_space<vmem>>, vector<16x1xf32>,
    return
  }
  func.func @transform_0(%arg0: i32) -> (i32, i32) {
    %c0_i32 = arith.constant 0 : i32
    %c0_i32_0 = arith.constant 0 : i32
    return %arg0, %c0_i32 : i32, i32
  }
  func.func @transform_1(%arg0: i32) -> (i32, i32) {
    %c0_i32 = arith.constant 0 : i32
    %c0_i32_0 = arith.constant 0 : i32
    %c0_i32_1 = arith.constant 0 : i32
    return %c0_i32, %c0_i32_0 : i32, i32
  }
  func.func @transform_2(%arg0: i32) -> (i32, i32) {
    %c0_i32 = arith.constant 0 : i32
    %c0_i32_0 = arith.constant 0 : i32
    %c0_i32_1 = arith.constant 0 : i32
    return %c0_i32, %c0_i32_0 : i32, i32
  }
  func.func @transform_3(%arg0: i32) -> (i32, i32) {
    %c0_i32 = arith.constant 0 : i32
    %c0_i32_0 = arith.constant 0 : i32
    return %arg0, %c0_i32 : i32, i32
  }
}

</mosaic_0001>

<bundles_post_ra>
// kernel: tpu_custom_call.1
= control target key start
LH: loop header
LB: loop body
LE: loop exit
PB: predicated region body
PF: predicated region fallthrough
CT: control target
= control target key end

     0   :  { %s685_s12 = smov 0   ;;  %s766_s0 = inlined_call_operand.vmem [shape: bf16[32,300], index: 0, kind: input, shape index: {}]   ;;  %s767_s1 = inlined_call_operand.vmem [shape: bf16[300,4], index: 1, kind: input, shape index: {}]   ;;  %s768_s2 = inlined_call_operand.vmem [shape: f32[1,8], index: 2, kind: input, shape index: {}]   ;;  %s769_s3 = inlined_call_operand.vmem [shape: f32[32,1], index: 3, kind: output, shape index: {}]  }
   0x1 LB: > { %s540_s13 = sadd.s32 4294967295, %s658_s12   ;;  %p544_p0 = scmp.ge.s32.totalorder %s658_s12, 1  ;;  %s658_s12 = sphi %s685_s12, %s13_s12  }
   0x2   : > { %p139_p1 = scmp.lt.s32.totalorder %s658_s12, 3 }
   0x4   : > { %p140_p2 = pnand %p544_p0, %p139_p1 }
   0x5   : > { %v625_v0 = vld [vmem:[%s767_s1 + $0x40] sm:$0xff] (!%p140_p2)   ;;  %v660_v2 = vmov (!%p140_p2), 0.0   ;;  %v627_v3 = vld [vmem:[%s767_s1 + $0x48] sm:$0xff] (!%p140_p2)   ;;  %s545_s20 = sshll.u32 (!%p140_p2), %s540_s13, 1  ;;  %v629_v5 = vld [vmem:[%s767_s1 + $0x50] sm:$0xff] (!%p140_p2)   ;;  %vm661_vm0 = vmmov (!%p140_p2), 0  }
   0x6   : > { %143 = sbr.rel (%p140_p2) target bundleno = 557 (0x22d), region = 32  ;;  %v626_v1 = vld [vmem:[%s767_s1] sm:$0xff] (!%p140_p2)   ;;  %601 = vmatprep.subr.bf16.mxu1 (!%p140_p2), %v660_v2  ;;  %575 = vmatprep.subr.bf16.mxu0 (!%p140_p2), %v625_v0  ;;  %v628_v4 = vld [vmem:[%s767_s1 + $0x8] sm:$0xff] (!%p140_p2)   ;;  %p165_p3 = scmp.lt.s32.totalorder (!%p140_p2), %s545_s20, 3  ;;  %v630_v6 = vld [vmem:[%s767_s1 + $0x10] sm:$0xff] (!%p140_p2)   ;;  %vm352_vm1 = vcmask (!%p140_p2), 1045504  }
   0x7   : > { %576 = vmatpush3.bf16.msra.mxu0 (!%p140_p2), %v626_v1  ;;  %607 = vmatprep.mubr.msk.bf16.mxu1 (!%p140_p2), %vm661_vm0, %v660_v2  ;;  %v631_v7 = vld [vmem:[%s767_s1 + $0x58] sm:$0xff] (!%p140_p2)   ;;  %v633_v9 = vld [vmem:[%s767_s1 + $0x60] sm:$0xff] (!%p140_p2)   ;;  %v640_v12 = vld [vmem:[%s767_s1 + $0x88] sm:$0xff] (!%p140_p2)   ;;  %vm348_vm2 = vcmask (!%p140_p2), 359424   ;;  %s662_s30 = smov (!%p140_p2), 125   ;;  %vm454_vm3 = vcmask (!%p140_p2), 23552  }
   0x8   : > { %577 = vmatprep.subr.bf16.mxu0 (!%p140_p2), %v627_v3  ;;  %v632_v8 = vld [vmem:[%s767_s1 + $0x18] sm:$0xff] (!%p140_p2)   ;;  %v637_v10 = vld [vmem:[%s767_s1 + $0x80] sm:$0xff] (!%p140_p2)   ;;  %v635_v13 = vld [vmem:[%s767_s1 + $0x68] sm:$0xff] (!%p140_p2)   ;;  %s664_s9 = smov (!%p140_p2), 122   ;;  %vm481_vm4 = vcmask (!%p140_p2), 7168  }
   0x9   : > { %v634_v11 = vld [vmem:[%s767_s1 + $0x20] sm:$0xff] (!%p140_p2)   ;;  %602 = vmatpush3.bf16.msra.mxu1 (!%p140_p2), %v637_v10  ;;  %v643_v14 = vld [vmem:[%s767_s1 + $0x90] sm:$0x3f] (!%p140_p2)   ;;  %v636_v15 = vld [vmem:[%s767_s1 + $0x28] sm:$0xff] (!%p140_p2)  }
   0xa   : > { %603 = vmatprep.subr.bf16.mxu1 (!%p140_p2), %v660_v2  ;;  %v638_v16 = vld [vmem:[%s767_s1 + $0x70] sm:$0xff] (!%p140_p2)   ;;  %v354_v17 = vsel (!%p140_p2), %vm352_vm1, %v643_v14, 0  ;;  %v572_v20 = vld [vmem:[%s768_s2] ss:$0 sm:$0xff] (!%p140_p2)  ;;  %v641_v22 = vld [vmem:[%s767_s1 + $0x78] sm:$0xff] (!%p140_p2)  }
   0xb   : > { %578 = vmatpush3.bf16.msra.mxu0 (!%p140_p2), %v628_v4  ;;  %v639_v21 = vld [vmem:[%s767_s1 + $0x30] sm:$0xff] (!%p140_p2)   ;;  %449 = vrot.lane.b32.xlu0 (!%p140_p2), %v572_v20, %s662_s30  ;;  %v642_v23 = vld [vmem:[%s767_s1 + $0x38] sm:$0xff] (!%p140_p2)  }
   0xc   : > { %579 = vmatprep.subr.bf16.mxu0 (!%p140_p2), %v629_v5 }
   0xd   : > { %s771_s20 = smov (!%p165_p3, %s545_s20), 3  ;;  %604 = vmatpush3.bf16.msra.mxu1 %v640_v12 }
   0xe   : > { %s611_s8 = smul.u32 12, %s771_s20  ;;  %605 = vmatprep.subr.bf16.mxu1 %v660_v2  ;;  %s548_s10 = sshll.u32 %s771_s20, 3 }
   0xf   : > { %580 = vmatpush3.bf16.msra.mxu0 %v630_v6  ;;  %s175_s14 = scalar_lea.vmem %s769_s3, %s548_s10 }
  0x10   : > { %581 = vmatprep.subr.bf16.mxu0 %v631_v7  ;;  %s169_s18 = scalar_lea.vmem %s766_s0, %s611_s8  ;;  %s663_s8 = smov 3  }
  0x11   : > { %v646_v18 = vld [vmem:[%s169_s18 + $0x4] ss:$12 sps:$4 sm:$0xff]   ;;  %v647_v19 = vld [vmem:[%s169_s18 + $0x8] ss:$12 sps:$4 sm:$0xff]   ;;  %606 = vmatpush3.bf16.msra.mxu1 %v354_v17  ;;  %v644_v24 = vld [vmem:[%s169_s18] ss:$12 sps:$4 sm:$0xff]  }
  0x12   : > { %388 = vmatprep.mubr.bf16.mxu0 %v646_v18 }
  0x13   : > { %582 = vmatpush3.bf16.msra.mxu0 %v632_v8 }
  0x14   : > { %583 = vmatprep.subr.bf16.mxu0 %v633_v9  ;;  %608 = vmatmul.mubr.msk.bf16.vlgmr.msra.gmra.mrb[0].mxu1 %vm348_vm2, %v647_v19 }
  0x17   : > { %584 = vmatpush3.bf16.msra.mxu0 %v634_v11 }
  0x18   : > { %585 = vmatprep.subr.bf16.mxu0 %v635_v13 }
  0x1b   : > { %586 = vmatpush3.bf16.msra.mxu0 %v636_v15 }
  0x1c   : > { %587 = vmatprep.subr.bf16.mxu0 %v638_v16 }
  0x1f   : > { %588 = vmatpush3.bf16.msra.mxu0 %v639_v21 }
  0x20   : > { %589 = vmatprep.subr.bf16.mxu0 %v641_v22 }
  0x23   : > { %590 = vmatpush3.bf16.msra.mxu0 %v642_v23 }
  0x26   : > { %389 = vmatmul.mubr.bf16.vlgmr.msra.gmra.mrb[0].mxu0 %v644_v24 }
  0x7d   : > { %v450_v38 = vpop.permute.xlu0 %449 }
  0xe7   : > { %v431_v25 = vpop.f32.mrb[0].mxu1 }
  0xe8   : > { %v609_v26 = vpop.f32.mrb[1].mxu1 }
  0xe9   : > { %v434_v27 = vpop.f32.mrb[2].mxu1 }
  0xea   : > { %v610_v28 = vpop.f32.mrb[3].mxu1 }
  0xf9   : > { %v591_v29 = vpop.f32.mrb[0].mxu0 }
  0xfa   : > { %v592_v30 = vpop.f32.mrb[1].mxu0 }
  0xfb   : > { %v593_v31 = vadd.f32 %v592_v30, %v591_v29  ;;  %v594_v32 = vpop.f32.mrb[2].mxu0 }
  0xfc   : > { %v595_v33 = vpop.f32.mrb[3].mxu0 }
  0xfd   : > { %v596_v34 = vadd.f32 %v595_v33, %v594_v32  ;;  %v432_v35 = vadd.f32 %v593_v31, %v431_v25 }
  0xff   : > { %v435_v36 = vadd.f32 %v596_v34, %v434_v27  ;;  %463 = vrot.lane.b32.xlu1 %v432_v35, %s663_s8  ;;  %v445_v37 = vadd.f32 %v572_v20, %v432_v35 }
 0x101   : > { %648 = vtanh.f32 %v445_v37  ;;  %v446_v41 = vadd.f32 %v572_v20, %v435_v36 }
 0x103   : > { %650 = vtanh.f32 %v446_v41 }
 0x10b   : > { %v649_v39 = vpop.eup %648 }
 0x10c   : > { %v452_v40 = vmul.f32 %v649_v39, %v450_v38 }
 0x10d   : > { %v651_v43 = vpop.eup %650 }
 0x10e   : > { %v455_v42 = vsel %vm454_vm3, %v452_v40, 0.0  ;;  %v453_v44 = vmul.f32 %v651_v43, %v450_v38 }
 0x10f   : > { %456 = vadd.xlane.f32.xlu0 %v455_v42 }
 0x110   : > { %v458_v45 = vsel %vm454_vm3, %v453_v44, 0.0 }
 0x123   : > { %459 = vadd.xlane.f32.xlu1 %v458_v45 }
 0x134   : > { %465 = vrot.lane.b32.xlu1 %v435_v36, %s663_s8 }
 0x171   : > { %v464_v46 = vpop.permute.xlu1 %463 }
 0x172   : > { %v469_v47 = vadd.f32 %v572_v20, %v464_v46 }
 0x19c   : > { %v457_v48 = vpop.xlane.xlu0 %456 }
 0x19d   : > { %v471_v49 = vadd.f32 %v469_v47, %v457_v48 }
 0x19f   : > { %475 = vrot.lane.b32.xlu1 %v471_v49, %s664_s9 }
 0x1b0   : > { %v460_v50 = vpop.xlane.xlu1 %459 }
 0x1b4   : > { %v466_v51 = vpop.permute.xlu1 %465 }
 0x1b5   : > { %v470_v52 = vadd.f32 %v572_v20, %v466_v51 }
 0x1b7   : > { %v472_v53 = vadd.f32 %v470_v52, %v460_v50 }
 0x1b9   : > { %477 = vrot.lane.b32.xlu1 %v472_v53, %s664_s9 }
 0x211   : > { %v476_v54 = vpop.permute.xlu1 %475 }
 0x212   : > { %482 = vst.msk [vmem:[%s175_s14] sm:$0xff] %vm481_vm4, %v476_v54 }
 0x22b   : > { %v478_v55 = vpop.permute.xlu1 %477 }
 0x22c   : > { %483 = vst.msk [vmem:[%s175_s14 + $0x8] sm:$0xff] %vm481_vm4, %v478_v55 }
 0x22d PF: > { %s13_s12 = sadd.s32 1, %s658_s12  }
 0x22e   : > { %p10_p4 = scmp.ge.s32.totalorder %s13_s12, 4  }
 0x230   :  { %12 = sbr.rel (!%p10_p4) target bundleno = 1 (0x1), region = 62 }

</bundles_post_ra>
